<compile_context>
chip_gen: v6e
topology: v6e:2x2x1
jax: 0.10.0
libtpu: 0.0.40
codegen_flags: <defaults>
</compile_context>

<pallas_src>
import functools

import jax
import jax.numpy as jnp
from jax.experimental import pallas as pl
from jax.experimental.pallas import tpu as pltpu

_MIB = 1024 * 1024


def _tpu_config():
    """Generation-aware tile / VMEM defaults keyed off per-core VMEM capacity."""
    try:
        vmem_cap = int(pltpu.get_tpu_info().vmem_capacity_bytes)
    except Exception:  # unknown / emulated target -> conservative config below
        vmem_cap = 0
    if vmem_cap >= 100 * _MIB:
        # v5e / v6e class: 128 MiB VMEM per TensorCore, single TC.
        return dict(tm=512, th=1024, vmem_limit=100 * _MIB,
                    weight_buffers=3, split_rows_for_cores=False)
    # v7x class (64 MiB VMEM per TC, 2 TCs) or unknown: conservative limits.
    return dict(tm=512, th=256, vmem_limit=44 * _MIB,
                weight_buffers=2, split_rows_for_cores=True)


def choose_hidden_tile(hidden_dim, max_th=None):
    """Largest hidden tile <= max_th that divides H and is a multiple of 128."""
    if max_th is None:
        max_th = _tpu_config()["th"]
    assert hidden_dim % 128 == 0, "hidden dim must be a multiple of 128 lanes"
    th = min(max_th, hidden_dim)
    th -= th % 128
    while th > 128 and hidden_dim % th != 0:
        th -= 128
    assert th >= 128 and th % 128 == 0 and hidden_dim % th == 0
    return th


def _ffn_kernel(x_ref, w13_ref, w2_ref, o_ref, *scratch, th):
    """Grid = (row tiles, hidden tiles).  For hidden tile k:
         h13  = x @ [w1_k | w3_k]       (one wide bf16 MXU matmul, f32 acc)
         g    = silu(h1) * h3           (f32 VPU/EUP)
         acc += g @ w2_k                (bf16 MXU matmul, f32 acc)
       acc is either the resident f32 output block (f32 output, no scratch)
       or an f32 VMEM scratch finalized into a narrower output dtype."""
    acc_ref = scratch[0] if scratch else o_ref
    k = pl.program_id(1)

    @pl.when(k == 0)
    def _():
        acc_ref[...] = jnp.zeros_like(acc_ref)

    x = x_ref[...]                                                # (tm, D) bf16
    w13 = w13_ref[0]                                              # (D, 2*th) bf16
    h13 = jnp.dot(x, w13, preferred_element_type=jnp.float32)     # (tm, 2*th) f32
    h1 = h13[:, :th]                                              # lane-aligned slices
    h3 = h13[:, th:]
    g = (h1 * jax.nn.sigmoid(h1)) * h3                            # SiLU gate, f32
    acc_ref[...] += jnp.dot(
        g.astype(w2_ref.dtype), w2_ref[...], preferred_element_type=jnp.float32
    )                                                             # (tm, D) f32

    if scratch:
        @pl.when(k == pl.num_programs(1) - 1)
        def _():
            o_ref[...] = acc_ref[...].astype(o_ref.dtype)


def prepare_params(w1, w2, w3, *, th, dtype=jnp.bfloat16):
    """One-time (param-load time) weight layout prep — NOT in the hot path.

    w1, w3: (H, D) torch.nn.Linear layout; w2: (D, H).
    Returns:
      w13: (H//th, D, 2*th) — hidden tile k holds [w1_k^T | w3_k^T].
      w2t: (H, D)           — w2 transposed for row-major g @ w2t.
    """
    H, D = w1.shape
    assert th % 128 == 0, "th must be a multiple of 128 (lane alignment)"
    assert H % th == 0, "th must divide the hidden dimension"
    hk = H // th
    w1t = w1.T.astype(dtype)                                  # (D, H)
    w3t = w3.T.astype(dtype)                                  # (D, H)
    w1b = w1t.reshape(D, hk, th).transpose(1, 0, 2)           # (hk, D, th)
    w3b = w3t.reshape(D, hk, th).transpose(1, 0, 2)           # (hk, D, th)
    w13 = jnp.concatenate([w1b, w3b], axis=-1)                # (hk, D, 2*th)
    w2t = w2.T.astype(dtype)                                  # (H, D)
    return w13, w2t


@functools.partial(jax.jit, static_argnames=("th", "tm", "out_dtype"))
def feed_forward(x, w13, w2t, *, th, tm=None, out_dtype=None):
    """x: (batch, seq, dim).  w13/w2t from prepare_params(th=th)."""
    B, S, D = x.shape
    hk = w13.shape[0]
    H = hk * th
    M = B * S
    assert w13.shape == (hk, D, 2 * th) and w2t.shape == (H, D)
    assert th % 128 == 0, "th must be a multiple of 128 (lane alignment)"

    out_dtype = jnp.dtype(out_dtype if out_dtype is not None else x.dtype)
    out_bytes = out_dtype.itemsize
    # f32 output: accumulate directly into the resident output block.
    use_scratch = out_dtype != jnp.dtype(jnp.float32)

    cfg = _tpu_config()
    if tm is None:
        tm = cfg["tm"]

    # Shrink tm until the estimated pipelined working set fits the VMEM budget.
    def _vmem_bytes(tm_):
        nbuf = cfg["weight_buffers"]
        x_b = 2 * tm_ * D * 2                        # bf16 x, double-buffered
        w13_b = nbuf * D * (2 * th) * 2              # bf16 [w1_k | w3_k]
        w2_b = nbuf * th * D * 2                     # bf16 w2_k
        o_b = 2 * tm_ * D * out_bytes                # output blocks
        acc_b = tm_ * D * 4 if use_scratch else 0    # f32 scratch accumulator
        return x_b + w13_b + w2_b + o_b + acc_b

    while tm > 128 and _vmem_bytes(tm) > 0.9 * cfg["vmem_limit"]:
        tm -= 128

    # Clamp to the problem size; keep bf16 sublane alignment.
    tm = min(tm, M)
    # v7x decode shapes: make sure both TensorCores get a row tile.
    # TODO(synk): split the hidden axis across cores for the single-row case.
    if cfg["split_rows_for_cores"] and pl.cdiv(M, tm) < 2 and M >= 32:
        tm = max(16, ((M // 2) // 16) * 16)
    if M % tm != 0:
        tm = max(16, (tm // 16) * 16)

    grid_rows = pl.cdiv(M, tm)

    x2 = x.reshape(M, D)
    if x2.dtype != jnp.bfloat16:   # pass bf16 activations to skip this cast pass
        x2 = x2.astype(jnp.bfloat16)

    # Optional deeper weight buffering on the bandwidth-tight 128 MiB parts.
    w_kwargs = {}
    if cfg["weight_buffers"] > 2 and hk >= cfg["weight_buffers"]:
        w_kwargs["pipeline_mode"] = pl.Buffered(cfg["weight_buffers"])
    w13_spec = pl.BlockSpec((1, D, 2 * th), lambda i, k: (k, 0, 0), **w_kwargs)
    w2_spec = pl.BlockSpec((th, D), lambda i, k: (k, 0), **w_kwargs)

    scratch = [pltpu.VMEM((tm, D), jnp.float32)] if use_scratch else []

    cost = pl.CostEstimate(
        flops=6 * M * D * H,                  # 2*M*D*2H (up) + 2*M*H*D (down)
        transcendentals=M * H,                # sigmoid in SiLU
        bytes_accessed=M * D * 2 + M * D * out_bytes + grid_rows * 6 * D * H,
    )

    out = pl.pallas_call(
        functools.partial(_ffn_kernel, th=th),
        out_shape=jax.ShapeDtypeStruct((M, D), out_dtype),
        grid_spec=pltpu.PrefetchScalarGridSpec(
            num_scalar_prefetch=0,
            grid=(grid_rows, hk),
            in_specs=[
                pl.BlockSpec((tm, D), lambda i, k: (i, 0)),   # x rows
                w13_spec,                                     # [w1_k | w3_k]
                w2_spec,                                      # w2_k
            ],
            out_specs=pl.BlockSpec((tm, D), lambda i, k: (i, 0)),
            scratch_shapes=scratch,
        ),
        compiler_params=pltpu.CompilerParams(
            dimension_semantics=("parallel", "arbitrary"),
            vmem_limit_bytes=cfg["vmem_limit"],
        ),
        cost_estimate=cost,
    )(x2, w13, w2t)

    return out.reshape(B, S, D)


def _reference(x, w1, w2, w3):
    """Pure-JAX reference mirroring the kernel's bf16-in / f32-accumulate math."""
    xb = x.astype(jnp.bfloat16)
    w1b = w1.astype(jnp.bfloat16)
    w2b = w2.astype(jnp.bfloat16)
    w3b = w3.astype(jnp.bfloat16)
    h1 = jnp.dot(xb, w1b.T, preferred_element_type=jnp.float32)
    h3 = jnp.dot(xb, w3b.T, preferred_element_type=jnp.float32)
    g = (h1 * jax.nn.sigmoid(h1)) * h3
    return jnp.dot(
        g.astype(jnp.bfloat16), w2b.T, preferred_element_type=jnp.float32
    ).astype(jnp.float32)


if __name__ == "__main__":
    # Module hyperparameters (small, consistent with the PyTorch ctor).
    dim = 128
    hidden_dim_arg = 384
    multiple_of = 128
    dropout_p = 0.0  # eval / p=0 -> identity

    # Recompute hidden_dim exactly as the PyTorch __init__ does.
    hidden = int(2 * hidden_dim_arg / 3)
    hidden = multiple_of * ((hidden + multiple_of - 1) // multiple_of)  # -> 256

    batch, seq = 2, 8

    key = jax.random.PRNGKey(0)
    kx, k1, k2, k3 = jax.random.split(key, 4)
    x = jax.random.normal(kx, (batch, seq, dim), dtype=jnp.float32)
    # nn.Linear weights stored as (out_features, in_features).
    w1 = jax.random.normal(k1, (hidden, dim), dtype=jnp.float32) * 0.02
    w2 = jax.random.normal(k2, (dim, hidden), dtype=jnp.float32) * 0.02
    w3 = jax.random.normal(k3, (hidden, dim), dtype=jnp.float32) * 0.02

    # Small-shape test: force th=128 (-> 2 hidden tiles) so the k-axis
    # accumulation path is exercised.  Production: choose_hidden_tile(hidden).
    th = choose_hidden_tile(hidden, max_th=128)
    w13, w2t = prepare_params(w1, w2, w3, th=th)

    ref = _reference(x, w1, w2, w3)

    # f32 output path (accumulates directly into the resident output block).
    out = feed_forward(x, w13, w2t, th=th)
    jax.block_until_ready(out)
    assert out.shape == (batch, seq, dim)
    assert jnp.allclose(out, ref, atol=2e-3, rtol=2e-2), "f32-out mismatch"

    # bf16 output path (f32 scratch accumulator, halved writeback DMA).
    out_bf16 = feed_forward(x, w13, w2t, th=th, out_dtype=jnp.bfloat16)
    jax.block_until_ready(out_bf16)
    assert jnp.allclose(
        out_bf16.astype(jnp.float32), ref, atol=8e-3, rtol=4e-2
    ), "bf16-out mismatch"

    print("KERNEL_OK")
</pallas_src>

<mosaic_0001>
module attributes {stable_mosaic.version = 11 : i64} {
  func.func @_ffn_kernel(%arg0: i32, %arg1: i32, %arg2: memref<16x128xbf16, #tpu.memory_space<vmem>>, %arg3: memref<1x128x256xbf16, #tpu.memory_space<vmem>>, %arg4: memref<128x128xbf16, #tpu.memory_space<vmem>>, %arg5: memref<16x128xf32, #tpu.memory_space<vmem>>) attributes {dimension_semantics = [#tpu.dimension_semantics<parallel>, #tpu.dimension_semantics<arbitrary>], iteration_bounds = array<i64: 1, 2>, scalar_prefetch = 0 : i64, scratch_operands = 0 : i64, tpu.core_type = #tpu.core_type<tc>, window_params = [{transform_indices = @transform_0, window_bounds = array<i64: 16, 128>}, {transform_indices = @transform_1, window_bounds = array<i64: 1, 128, 256>}, {transform_indices = @transform_2, window_bounds = array<i64: 128, 128>}, {transform_indices = @transform_3, window_bounds = array<i64: 16, 128>}]} {
    %c0_i32 = arith.constant 0 : i32
    %0 = arith.cmpi eq, %arg1, %c0_i32 : i32
    %1 = arith.extui %0 : i1 to i32
    %c0_i32_0 = arith.constant 0 : i32
    %2 = arith.cmpi ne, %1, %c0_i32_0 : i32
    scf.if %2 {
      %cst_13 = arith.constant 0.000000e+00 : f32
      %22 = vector.broadcast %cst_13 : f32 to vector<16x128xf32>
      %c0_14 = arith.constant 0 : index
      %c0_15 = arith.constant 0 : index
      %23 = vector.load %arg5[%c0_14, %c0_15] : memref<16x128xf32, #tpu.memory_space<vmem>>, vector<16x128xf32>
      tpu.vector_store %arg5[%c0_14, %c0_15], %22 {strides = array<i32>} : memref<16x128xf32, #tpu.memory_space<vmem>>, vector<16x128xf32>,
    } else {
    }
    %c0 = arith.constant 0 : index
    %c0_1 = arith.constant 0 : index
    %3 = vector.load %arg2[%c0, %c0_1] : memref<16x128xbf16, #tpu.memory_space<vmem>>, vector<16x128xbf16>
    %c0_2 = arith.constant 0 : index
    %c0_3 = arith.constant 0 : index
    %c0_4 = arith.constant 0 : index
    %4 = vector.load %arg3[%c0_2, %c0_3, %c0_4] : memref<1x128x256xbf16, #tpu.memory_space<vmem>>, vector<1x128x256xbf16>
    %5 = vector.shape_cast %4 : vector<1x128x256xbf16> to vector<128x256xbf16>
    %cst = arith.constant dense<0.000000e+00> : vector<16x256xf32>
    %6 = tpu.matmul %3, %5, %cst {dimension_numbers = #tpu.dot_dimension_numbers<[1], [0], [0], [1], [0, 0, 1, 1], [], []>} : vector<16x128xbf16>, vector<128x256xbf16>, vector<16x256xf32> -> vector<16x256xf32>
    %7 = vector.extract_strided_slice %6 {offsets = [0, 0], sizes = [16, 128], strides = [1, 1]} : vector<16x256xf32> to vector<16x128xf32>
    %8 = vector.extract_strided_slice %6 {offsets = [0, 128], sizes = [16, 128], strides = [1, 1]} : vector<16x256xf32> to vector<16x128xf32>
    %9 = arith.negf %7 : vector<16x128xf32>
    %10 = math.exp %9 : vector<16x128xf32>
    %cst_5 = arith.constant 1.000000e+00 : f32
    %11 = vector.broadcast %cst_5 : f32 to vector<16x128xf32>
    %12 = arith.addf %11, %10 : vector<16x128xf32>
    %13 = arith.divf %11, %12 : vector<16x128xf32>
    %14 = arith.mulf %7, %13 : vector<16x128xf32>
    %15 = arith.mulf %14, %8 : vector<16x128xf32>
    %c0_6 = arith.constant 0 : index
    %c0_7 = arith.constant 0 : index
    %16 = vector.load %arg5[%c0_6, %c0_7] : memref<16x128xf32, #tpu.memory_space<vmem>>, vector<16x128xf32>
    %17 = arith.truncf %15 : vector<16x128xf32> to vector<16x128xbf16>
    %c0_8 = arith.constant 0 : index
    %c0_9 = arith.constant 0 : index
    %18 = vector.load %arg4[%c0_8, %c0_9] : memref<128x128xbf16, #tpu.memory_space<vmem>>, vector<128x128xbf16>
    %cst_10 = arith.constant dense<0.000000e+00> : vector<16x128xf32>
    %19 = tpu.matmul %17, %18, %cst_10 {dimension_numbers = #tpu.dot_dimension_numbers<[1], [0], [0], [1], [0, 0, 1, 1], [], []>} : vector<16x128xbf16>, vector<128x128xbf16>, vector<16x128xf32> -> vector<16x128xf32>
    %20 = arith.addf %16, %19 : vector<16x128xf32>
    %c0_11 = arith.constant 0 : index
    %c0_12 = arith.constant 0 : index
    %21 = vector.load %arg5[%c0_11, %c0_12] : memref<16x128xf32, #tpu.memory_space<vmem>>, vector<16x128xf32>
    tpu.vector_store %arg5[%c0_11, %c0_12], %20 {strides = array<i32>} : memref<16x128xf32, #tpu.memory_space<vmem>>, vector<16x128xf32>,
    return
  }
  func.func @transform_0(%arg0: i32, %arg1: i32) -> (i32, i32) {
    %c0_i32 = arith.constant 0 : i32
    %c0_i32_0 = arith.constant 0 : i32
    return %arg0, %c0_i32 : i32, i32
  }
  func.func @transform_1(%arg0: i32, %arg1: i32) -> (i32, i32, i32) {
    %c0_i32 = arith.constant 0 : i32
    %c0_i32_0 = arith.constant 0 : i32
    %c0_i32_1 = arith.constant 0 : i32
    return %arg1, %c0_i32, %c0_i32_0 : i32, i32, i32
  }
  func.func @transform_2(%arg0: i32, %arg1: i32) -> (i32, i32) {
    %c0_i32 = arith.constant 0 : i32
    %c0_i32_0 = arith.constant 0 : i32
    return %arg1, %c0_i32 : i32, i32
  }
  func.func @transform_3(%arg0: i32, %arg1: i32) -> (i32, i32) {
    %c0_i32 = arith.constant 0 : i32
    %c0_i32_0 = arith.constant 0 : i32
    return %arg0, %c0_i32 : i32, i32
  }
}

</mosaic_0001>

<bundles_post_ra>
// kernel: feed_forward.1
= control target key start
LH: loop header
LB: loop body
LE: loop exit
PB: predicated region body
PF: predicated region fallthrough
CT: control target
= control target key end

     0   :  { %8 = vsyncpa [#allocation3], 0  ;;  %s1188_s0 = inlined_call_operand.vmem [shape: bf16[16,128], index: 0, kind: input, shape index: {}]   ;;  %s1189_s1 = inlined_call_operand.hbm [shape: bf16[2,128,256], index: 1, kind: input, shape index: {}]   ;;  %s1190_s2 = inlined_call_operand.hbm [shape: bf16[256,128], index: 2, kind: input, shape index: {}]   ;;  %s1191_s3 = inlined_call_operand.hbm [shape: f32[16,128], index: 3, kind: output, shape index: {}]  }
   0x1   :  { %10 = vsyncpa [#allocation3 + $0x1], 0 }
   0x2   :  { %11 = vsyncpa [#allocation6], 0 }
   0x3   :  { %13 = vsyncpa [#allocation6 + $0x1], 0 }
   0x4   :  { %14 = vsyncpa [#allocation4], 0  ;;  %s1018_s12 = smov 0   ;;  %s1020_s13 = smov 0  }
   0x5   :  { %s1022_s14 = smov 0   ;;  %s1024_s15 = smov 0  }
   0x6   :  { %s1026_s16 = smov 0   ;;  %s1028_s17 = smov 0  }
   0x7 LB: > { %s651_s18 = sadd.s32 4294967295, %s983_s17   ;;  %s29_s19 = sadd.s32 1, %s979_s16  ;;  %s983_s17 = sphi %s1028_s17, %s20_s17   ;;  %s979_s16 = sphi %s1026_s16, %s1201_s16   ;;  %s975_s15 = sphi %s1024_s15, %s1200_s15   ;;  %s971_s14 = sphi %s1022_s14, %s1199_s14   ;;  %s967_s13 = sphi %s1020_s13, %s1198_s13   ;;  %s963_s12 = sphi %s1018_s12, %s1197_s12  }
   0x8   : > { %p30_p0 = scmp.ge.s32.totalorder %s29_s19, 2  ;;  %s65_s20 = sadd.s32 1, %s971_s14 }
   0x9   : > { %p72_p1 = scmp.ne.s32.totalorder %s971_s14, %s967_s13  ;;  %p73_p2 = scmp.eq.s32.totalorder %s983_s17, 0 }
   0xa   : > { %s1203_s19 = smov (%p30_p0, %s29_s19), 0  ;;  %p78_p4 = scmp.ne.s32.totalorder %s967_s13, %s963_s12 }
   0xb   : > { %p1054_p3 = por %p73_p2, %p72_p1  ;;  %s62_s22 = ssub.s32 %s979_s16, %s1203_s19 }
   0xc   : > { %p79_p5 = scmp.eq.s32.totalorder %s651_s18, 0  ;;  %p63_p6 = scmp.eq.s32.totalorder %s62_s22, 0 }
   0xd   : > { %p742_p8 = scmp.lt.s32.totalorder %s983_s17, 2  ;;  %s1072_s25 = sand.u32 1, %s971_s14  }
   0xe   : > { %p1063_p7 = por %p79_p5, %p78_p4  ;;  %s696_s26 = sshll.u32 %s979_s16, 11 }
   0xf   : > { %s1069_s24 = scalar_select %p63_p6, %s971_s14, %s65_s20  }
  0x10   : > { %s655_s27 = sshll.u32 %s1072_s25, 7  ;;  %s173_s30 = scalar_lea.hbm %s1189_s1, %s696_s26 }
  0x11   : > { %s167_s4 = scalar_lea.vmem [#allocation2], %s655_s27  ;;  %p1081_p9 = pnand %p742_p8, %p1054_p3 }
  0x12   : > { %s174_s5 = sshll.u32 %s167_s4, 4  ;;  %s164_s7 = scalar_lea.sflag [#allocation3], %s1072_s25  ;;  %s175_s5 = int_to_ptr.vmem [resolvable:$true] %s174_s5 }
  0x13   : > { %p847_p10 = pneg %p1081_p9  ;;  %s858_s8 = scalar_lea.vmem %s175_s5, 2048 }
  0x14   : > { %p859_p11 = scmp.ne.s32.totalorder %s175_s5, %s858_s8  ;;  %s985_s9 = smov [#allocation2]  }
  0x15   : > { %s863_s10 = sshll.u32 %s985_s9, 4  ;;  %s864_s10 = int_to_ptr.vmem [resolvable:$false] %s863_s10 }
  0x16   : > { %p861_p12 = pnand %p859_p11, %p847_p10  ;;  %s865_s11 = scalar_lea.vmem %s864_s10, 4096 }
  0x17   : > { %p866_p0 = scmp.lt.s32.totalorder %s175_s5, %s864_s10  ;;  %p867_p1 = scmp.lt.s32.totalorder %s865_s11, %s858_s8 }
  0x18   : > { %p862_p13 = pneg %p861_p12 }
  0x19   : > { %p868_p2 = por %p867_p1, %p866_p0 }
  0x1b   : > { %p869_p3 = pnand %p868_p2, %p862_p13 }
  0x1d   : > { %872 = shalt.err (!%p869_p3)
}
  0x1e   : > { %s986_s12 = smov 128   ;;  %s987_s20 = smov 8  }
  0x1f   : > { %738 = dma.hbm_to_vmem [thread:$0]  (!%p1081_p9), %s173_s30, 2048, %s175_s5, %s164_s7, %s986_s12, %s986_s12, %s987_s20  }
  0x20   : > { %p661_p4 = scmp.ge.s32.totalorder %s983_s17, 1  ;;  %p203_p5 = scmp.lt.s32.totalorder %s983_s17, 3 }
  0x21   : > { %s658_s21 = sshll.u32 %s1072_s25, 6  ;;  %s697_s26 = sshll.u32 %s979_s16, 10 }
  0x22   : > { %p1096_p6 = pnand %p661_p4, %p203_p5  ;;  %s188_s27 = scalar_lea.vmem [#allocation5], %s658_s21 }
  0x23   : > { %s195_s28 = sshll.u32 %s188_s27, 4  ;;  %s194_s8 = scalar_lea.hbm %s1190_s2, %s697_s26  ;;  %s196_s28 = int_to_ptr.vmem [resolvable:$true] %s195_s28 }
  0x24   : > { %s185_s9 = scalar_lea.sflag [#allocation6], %s1072_s25  ;;  %s886_s10 = scalar_lea.vmem %s196_s28, 1024 }
  0x25   : > { %p887_p8 = scmp.ne.s32.totalorder %s196_s28, %s886_s10  ;;  %s988_s30 = smov [#allocation5]  }
  0x26   : > { %s891_s5 = sshll.u32 %s988_s30, 4  ;;  %s892_s5 = int_to_ptr.vmem [resolvable:$false] %s891_s5 }
  0x27   : > { %p889_p11 = pnand %p887_p8, %p847_p10  ;;  %s893_s7 = scalar_lea.vmem %s892_s5, 2048 }
  0x28   : > { %p894_p13 = scmp.lt.s32.totalorder %s196_s28, %s892_s5  ;;  %p895_p0 = scmp.lt.s32.totalorder %s893_s7, %s886_s10 }
  0x29   : > { %p890_p12 = pneg %p889_p11 }
  0x2a   : > { %p896_p1 = por %p895_p0, %p894_p13 }
  0x2c   : > { %p897_p2 = pnand %p896_p1, %p890_p12 }
  0x2e   : > { %900 = shalt.err (!%p897_p2)
}
  0x2f   : > { %s989_s11 = smov 64   ;;  %s990_s12 = smov 4  }
  0x30   : > { %741 = dma.hbm_to_vmem [thread:$0]  (!%p1081_p9), %s194_s8, 1024, %s196_s28, %s185_s9, %s989_s11, %s989_s11, %s990_s12  }
  0x31   : > { %207 = sbr.rel (%p1096_p6) target bundleno = 540 (0x21c), region = 32  ;;  %s209_s25 = sand.u32 (!%p1096_p6), 1, %s967_s13  }
  0x32   : > { %s662_s20 = sshll.u32 (!%p1096_p6), %s209_s25, 7  ;;  %s210_s21 = scalar_lea.sflag (!%p1096_p6), [#allocation3], %s209_s25 }
  0x33   : > { %s1113_s26 = scalar_lea.vmem (!%p1096_p6), [#allocation2], %s662_s20 }
  0x36   : > { %950 = dma.done.wait (%p1063_p7), %s210_s21, 2048  }
  0x37   : > { %952 = vsyncadd (%p1063_p7), %s210_s21, 4294965248  ;;  %s663_s27 = sshll.u32 %s209_s25, 6  ;;  %s219_s29 = scalar_lea.sflag [#allocation6], %s209_s25 }
  0x38   : > { %s1119_s6 = scalar_lea.vmem [#allocation5], %s663_s27 }
  0x39   : > { %954 = dma.done.wait (%p1063_p7), %s219_s29, 1024  }
  0x3a   : > { %956 = vsyncadd (%p1063_p7), %s219_s29, 4294966272  ;;  %p664_p9 = scmp.ne.s32.totalorder %s975_s15, 0 }
  0x3c   : > { %262 = sbr.rel (%p664_p9) target bundleno = 67 (0x43), region = 44 }
  0x41   : > { %v991_v0 = vmov 0.0  }
  0x42   : > { %263 = vst [vmem:[#allocation7] sm:$0xff] %v991_v0  ;;  %264 = vst [vmem:[#allocation7 + $0x8] sm:$0xff] %v991_v0 }
  0x43 PF: > { %v804_v1 = vld [vmem:[%s1113_s26 + $0x74] ss:$8 sps:$4 sm:$0xff]   ;;  %v806_v2 = vld [vmem:[%s1113_s26 + $0x70] ss:$8 sps:$4 sm:$0xff]   ;;  %v992_v3 = vmov 0   ;;  %v828_v18 = vld [vmem:[%s1188_s0] sm:$0xff]  }
  0x44   : > { %401 = vmatprep.mubr.bf16.mxu0 %v992_v3  ;;  %369 = vmatprep.subr.bf16.mxu0 %v804_v1  ;;  %v807_v4 = vld [vmem:[%s1113_s26 + $0x64] ss:$8 sps:$4 sm:$0xff]   ;;  %v809_v5 = vld [vmem:[%s1113_s26 + $0x60] ss:$8 sps:$4 sm:$0xff]   ;;  %v810_v6 = vld [vmem:[%s1113_s26 + $0x54] ss:$8 sps:$4 sm:$0xff]  }
  0x45   : > { %370 = vmatpush1.bf16.msra.mxu0 %v806_v2  ;;  %v812_v7 = vld [vmem:[%s1113_s26 + $0x50] ss:$8 sps:$4 sm:$0xff]   ;;  %v813_v8 = vld [vmem:[%s1113_s26 + $0x44] ss:$8 sps:$4 sm:$0xff]   ;;  %v815_v9 = vld [vmem:[%s1113_s26 + $0x40] ss:$8 sps:$4 sm:$0xff]  }
  0x46   : > { %371 = vmatprep.subr.bf16.mxu0 %v807_v4  ;;  %v816_v10 = vld [vmem:[%s1113_s26 + $0x34] ss:$8 sps:$4 sm:$0xff]   ;;  %v818_v11 = vld [vmem:[%s1113_s26 + $0x30] ss:$8 sps:$4 sm:$0xff]   ;;  %v819_v12 = vld [vmem:[%s1113_s26 + $0x24] ss:$8 sps:$4 sm:$0xff]  }
  0x47   : > { %v821_v13 = vld [vmem:[%s1113_s26 + $0x20] ss:$8 sps:$4 sm:$0xff]   ;;  %v822_v14 = vld [vmem:[%s1113_s26 + $0x14] ss:$8 sps:$4 sm:$0xff]   ;;  %v824_v15 = vld [vmem:[%s1113_s26 + $0x10] ss:$8 sps:$4 sm:$0xff]  }
  0x48   : > { %v825_v16 = vld [vmem:[%s1113_s26 + $0x4] ss:$8 sps:$4 sm:$0xff]   ;;  %v827_v17 = vld [vmem:[%s1113_s26] ss:$8 sps:$4 sm:$0xff]   ;;  %v829_v19 = vld [vmem:[%s1119_s6 + $0x38] sm:$0xff]   ;;  %v993_v20 = vmov 0.0  }
  0x49   : > { %372 = vmatpush1.bf16.msra.mxu0 %v809_v5  ;;  %707 = vmatprep.subr.bf16.mxu1 %v993_v20  ;;  %v830_v21 = vld [vmem:[%s1119_s6 + $0x30] sm:$0xff]   ;;  %v831_v22 = vld [vmem:[%s1119_s6 + $0x28] sm:$0xff]   ;;  %v832_v23 = vld [vmem:[%s1119_s6 + $0x20] sm:$0xff]   ;;  %vm994_vm0 = vmmov 0   ;;  %s995_s22 = smov [#allocation7]   ;;  %p1155_p7 = scmp.eq.s32.totalorder %s651_s18, 1 }
  0x4a   : > { %373 = vmatprep.subr.bf16.mxu0 %v810_v6  ;;  %708 = vmatpush3.bf16.msra.mxu1 %v829_v19  ;;  %v833_v24 = vld [vmem:[%s1119_s6 + $0x18] sm:$0xff]   ;;  %v834_v25 = vld [vmem:[%s1119_s6 + $0x10] sm:$0xff]   ;;  %v835_v26 = vld [vmem:[%s1119_s6 + $0x8] sm:$0xff]   ;;  %s549_s28 = sshll.u32 %s995_s22, 4  ;;  %s550_s28 = int_to_ptr.vmem [resolvable:$true] %s549_s28 }
  0x4b   : > { %709 = vmatprep.subr.bf16.mxu1 %v993_v20  ;;  %v836_v27 = vld [vmem:[%s1119_s6] sm:$0xff]   ;;  %723 = vmatprep.mubr.msk.bf16.mxu1 %vm994_vm0, %v993_v20  ;;  %v429_v49 = vld [vmem:[#allocation7 + $0x8] sm:$0xff]  ;;  %s901_s8 = scalar_lea.vmem %s550_s28, 256  ;;  %p908_p5 = scmp.lt.s32.totalorder %s550_s28, %s550_s28 }
  0x4c   : > { %v428_v45 = vld [vmem:[#allocation7] sm:$0xff]  ;;  %p902_p10 = scmp.ne.s32.totalorder %s550_s28, %s901_s8  ;;  %p909_p6 = scmp.lt.s32.totalorder %s901_s8, %s901_s8 }
  0x4d   : > { %374 = vmatpush1.bf16.msra.mxu0 %v812_v7 }
  0x4e   : > { %375 = vmatprep.subr.bf16.mxu0 %v813_v8  ;;  %710 = vmatpush3.bf16.msra.mxu1 %v830_v21  ;;  %p903_p3 = pnand %p902_p10, %p1155_p7  ;;  %p910_p8 = por %p909_p6, %p908_p5 }
  0x4f   : > { %711 = vmatprep.subr.bf16.mxu1 %v993_v20 }
  0x50   : > { %p904_p4 = pneg %p903_p3 }
  0x51   : > { %376 = vmatpush1.bf16.msra.mxu0 %v815_v9 }
  0x52   : > { %377 = vmatprep.subr.bf16.mxu0 %v816_v10  ;;  %712 = vmatpush3.bf16.msra.mxu1 %v831_v22  ;;  %p911_p11 = pnand %p910_p8, %p904_p4 }
  0x53   : > { %713 = vmatprep.subr.bf16.mxu1 %v993_v20 }
  0x55   : > { %378 = vmatpush1.bf16.msra.mxu0 %v818_v11 }
  0x56   : > { %379 = vmatprep.subr.bf16.mxu0 %v819_v12  ;;  %714 = vmatpush3.bf16.msra.mxu1 %v832_v23 }
  0x57   : > { %715 = vmatprep.subr.bf16.mxu1 %v993_v20 }
  0x59   : > { %380 = vmatpush1.bf16.msra.mxu0 %v821_v13 }
  0x5a   : > { %381 = vmatprep.subr.bf16.mxu0 %v822_v14  ;;  %716 = vmatpush3.bf16.msra.mxu1 %v833_v24 }
  0x5b   : > { %717 = vmatprep.subr.bf16.mxu1 %v993_v20 }
  0x5d   : > { %382 = vmatpush1.bf16.msra.mxu0 %v824_v15 }
  0x5e   : > { %383 = vmatprep.subr.bf16.mxu0 %v825_v16  ;;  %718 = vmatpush3.bf16.msra.mxu1 %v834_v25 }
  0x5f   : > { %719 = vmatprep.subr.bf16.mxu1 %v993_v20 }
  0x61   : > { %384 = vmatpush1.bf16.msra.mxu0 %v827_v17 }
  0x62   : > { %720 = vmatpush3.bf16.msra.mxu1 %v835_v26 }
  0x63   : > { %721 = vmatprep.subr.bf16.mxu1 %v993_v20 }
  0x64   : > { %402 = vmatmul.mubr.bf16.vlgmr.msra.gmra.mxu0 %v828_v18 }
  0x66   : > { %722 = vmatpush3.bf16.msra.mxu1 %v836_v27 }
 0x124   : > { %v403_v28 = vpop.f32.mrf.mxu0 }
 0x125   : > { %v682_v29 = vmul.f32 -1.442695, %v403_v28 }
 0x126   : > { %v405_v30 = vpop.f32.mrf.mxu0 }
 0x127   : > { %837 = vpow2.f32 %v682_v29 }
 0x128   : > { %v407_v31 = vpop.f32.mrf.mxu0 }
 0x129   : > { %v683_v32 = vmul.f32 -1.442695, %v407_v31 }
 0x12a   : > { %v409_v41 = vpop.f32.mrf.mxu0 }
 0x12b   : > { %839 = vpow2.f32 %v683_v32 }
 0x134   : > { %v838_v33 = vpop.eup %837 }
 0x135   : > { %v418_v34 = vadd.f32 1.0, %v838_v33 }
 0x137   : > { %841 = vrcp.f32 %v418_v34 }
 0x138   : > { %v840_v35 = vpop.eup %839 }
 0x139   : > { %v419_v36 = vadd.f32 1.0, %v840_v35 }
 0x13b   : > { %843 = vrcp.f32 %v419_v36 }
 0x144   : > { %v842_v37 = vpop.eup %841 }
 0x145   : > { %v424_v38 = vmul.f32 %v842_v37, %v403_v28 }
 0x147   : > { %v426_v42 = vmul.f32 %v424_v38, %v405_v30 }
 0x148   : > { %v844_v39 = vpop.eup %843 }
 0x149   : > { %v425_v40 = vmul.f32 %v844_v39, %v407_v31 }
 0x14b   : > { %v427_v43 = vmul.f32 %v425_v40, %v409_v41 }
 0x14d   : > { %v430_v44 = vpack.c.bf16 %v427_v43, %v426_v42 }
 0x14f   : > { %724 = vmatmul.mubr.bf16.vlgmr.msra.gmra.mxu1 %v430_v44 }
 0x20f   : > { %v529_v46 = vpop.f32.mrf.mxu1 }
 0x210   : > { %v536_v47 = vadd.f32 %v529_v46, %v428_v45 }
 0x211   : > { %v725_v48 = vpop.f32.mrf.mxu1 }
 0x212   : > { %538 = vst [vmem:[#allocation7] sm:$0xff] %v536_v47 }
 0x213   : > { %v532_v50 = vpop.f32.mrf.mxu1 }
 0x214   : > { %v537_v51 = vadd.f32 %v532_v50, %v429_v49 }
 0x215   : > { %v726_v52 = vpop.f32.mrf.mxu1 }
 0x216   : > { %539 = vst [vmem:[#allocation7 + $0x8] sm:$0xff] %v537_v51 }
 0x217   : > { %914 = shalt.err (!%p911_p11)
}
 0x218   : > { %s996_s9 = smov 128   ;;  %s997_s18 = smov 8  }
 0x219   : > { %732 = dma.vmem_to_hbm [thread:$0]  (%p1155_p7), %s550_s28, 256, %s1191_s3, [#allocation4], %s996_s9, %s996_s9, %s997_s18  }
 0x21a   : > { %958 = dma.done.wait (%p1155_p7), [#allocation4], 256  }
 0x21b   : > { %960 = vsyncadd (%p1155_p7), [#allocation4], 4294967040 }
 0x21c PF: > { %s20_s17 = sadd.s32 1, %s983_s17   ;;  %s1197_s12 = smov %s967_s13 }
 0x21d   : > { %p17_p12 = scmp.ge.s32.totalorder %s20_s17, 4   ;;  %s1198_s13 = smov %s971_s14 }
 0x21e   : > { %s1199_s14 = smov %s1069_s24  ;;  %s1200_s15 = smov %s979_s16 }
 0x21f   : > { %s1201_s16 = smov %s1203_s19  ;;  %19 = sbr.rel (!%p17_p12) target bundleno = 7 (0x7), region = 90 }
 0x224   :  { %565 = vsyncpa [#allocation3], 1 }
 0x225   :  { %567 = vsyncpa [#allocation3 + $0x1], 1 }
 0x226   :  { %568 = vsyncpa [#allocation6], 1 }
 0x227   :  { %570 = vsyncpa [#allocation6 + $0x1], 1 }
 0x228   :  { %571 = vsyncpa [#allocation4], 1 }
 0x229   :  { %573 = vsyncpa [#allocation4 + $0x1], 1 }

</bundles_post_ra>
